<compile_context>
chip_gen: v5e
topology: v5e:2x2
jax: 0.10.0
libtpu: 0.0.40
codegen_flags: <defaults>
</compile_context>

<pallas_src>
import functools

import jax
import jax.numpy as jnp
from jax.experimental import pallas as pl
from jax.experimental.pallas import tpu as pltpu


def _conv_tile(xa_ref, xb_ref, w_ref, *, TH, kH):
    """Conv (no bias) for the TH output rows of this grid step.

    xa_ref: (1, TH, LK)  current padded-row block (bf16, lane = column*Cin + c)
    xb_ref: (1, TH, LK)  next padded-row block (only its first kH-1 rows are used)
    w_ref : (kH, LK, NP) banded weight (bf16); output lane = x*Cout + co
    returns (TH, NP) f32
    """
    # TH + kH - 1 row window; all later slicing is static (no pl.ds address math).
    win = jnp.concatenate([xa_ref[0], xb_ref[0, :kH - 1, :]], axis=0)
    acc = None
    for ky in range(kH):
        part = jnp.dot(win[ky:ky + TH, :], w_ref[ky],
                       preferred_element_type=jnp.float32)
        acc = part if acc is None else acc + part
    return acc


def _conv_stats_kernel(xa_ref, xb_ref, w_ref, stat_ref, *, TH, kH, H):
    """Pass 1: per-tile (sum, centered second moment) partials per packed lane."""
    conv = _conv_tile(xa_ref, xb_ref, w_ref, TH=TH, kH=kH)        # (TH, NP) f32
    row0 = pl.program_id(1) * TH
    rid = row0 + jax.lax.broadcasted_iota(jnp.int32, (TH, 1), 0)
    valid = (rid < H).astype(jnp.float32)                          # tail-row mask
    m_t = jnp.minimum(TH, H - row0).astype(jnp.float32)            # valid rows
    s = jnp.sum(conv * valid, axis=0, keepdims=True)               # (1, NP)
    mu = s / m_t
    d = (conv - mu) * valid
    m2 = jnp.sum(d * d, axis=0, keepdims=True)                     # (1, NP)
    np_ = s.shape[-1]
    stat_ref[...] = jnp.concatenate([s, m2], axis=0).reshape(1, 1, 2, np_)


def _conv_bn_relu_kernel(xa_ref, xb_ref, w_ref, st_ref, o_ref, *, TH, kH):
    """Pass 2: recompute conv tile, apply folded BN affine + ReLU, bf16 store."""
    conv = _conv_tile(xa_ref, xb_ref, w_ref, TH=TH, kH=kH)         # (TH, NP) f32
    y = jnp.maximum(conv * st_ref[0:1, :] + st_ref[1:2, :], 0.0)   # f32 epilogue
    o_ref[...] = y.astype(o_ref.dtype).reshape(1, TH, y.shape[-1])


@functools.partial(jax.jit, static_argnames=("eps", "row_tile"))
def convolution_layer_forward(x_nchw, weight, bias, gamma, beta,
                              eps=1e-5, row_tile=8):
    """Equivalent of ConvolutionLayer.forward: (N, Cin, H, W) -> (N, Cout, H, W)."""
    # Conv bias shifts the activations and the batch mean identically, so it
    # cancels inside (x - mean): BN(conv + b) == BN(conv) for batch statistics.
    del bias
    N, Cin, H, W = x_nchw.shape
    Cout, Cin_w, kH, kW = weight.shape
    assert Cin_w == Cin
    assert kH % 2 == 1 and kW % 2 == 1, "only odd 'same'-padded kernels supported"
    ph, pw = (kH - 1) // 2, (kW - 1) // 2

    TH = row_tile                                # output rows per grid step
    assert TH % 8 == 0 and TH >= kH - 1
    R = pl.cdiv(H, TH)                           # row tiles (tail rows masked)
    Wp = W + 2 * pw
    WC = W * Cout                                # packed output lanes (real)
    LK = 128 * pl.cdiv(Wp * Cin, 128)            # padded contraction lanes
    NP = 128 * pl.cdiv(WC, 128)                  # padded packed-output lanes
    Hpad = (R + 1) * TH                          # extra block keeps halo spec in range

    # ---- one-time layout prep (same jit, so it fuses with surrounding glue) ----
    x_nhwc = jnp.transpose(x_nchw, (0, 2, 3, 1)).astype(jnp.bfloat16)
    xp = jnp.pad(x_nhwc, ((0, 0), (ph, Hpad - H - ph), (pw, pw), (0, 0)))
    xp = xp.reshape(N, Hpad, Wp * Cin)
    xp = jnp.pad(xp, ((0, 0), (0, 0), (0, LK - Wp * Cin)))           # lane pad

    # Banded weight: B[ky, xi*Cin + c, x*Cout + co] = w[co, c, ky, xi - x]
    # for 0 <= xi - x < kW, else 0.  The kx taps live inside the band.
    wt = jnp.transpose(weight.astype(jnp.float32), (2, 3, 1, 0))     # (kH,kW,Cin,Cout)
    d = jnp.arange(Wp)[:, None] - jnp.arange(W)[None, :]             # (Wp, W)
    band = ((d >= 0) & (d < kW)).astype(jnp.float32)
    B = wt[:, jnp.clip(d, 0, kW - 1), :, :] * band[None, :, :, None, None]
    B = jnp.transpose(B, (0, 1, 3, 2, 4)).reshape(kH, Wp * Cin, WC)
    B = jnp.pad(B, ((0, 0), (0, LK - Wp * Cin), (0, NP - WC))).astype(jnp.bfloat16)

    grid = (N, R)
    xa_spec = pl.BlockSpec((1, TH, LK), lambda n, r: (n, r, 0))      # current rows
    xb_spec = pl.BlockSpec((1, TH, LK), lambda n, r: (n, r + 1, 0))  # halo rows
    w_spec = pl.BlockSpec((kH, LK, NP), lambda n, r: (0, 0, 0))      # resident
    cparams = pltpu.CompilerParams(
        dimension_semantics=("parallel", "parallel"),
        vmem_limit_bytes=32 * 1024 * 1024)

    # ---- pass 1: per-tile (sum, centered-M2) partials over the packed lanes ----
    stats = pl.pallas_call(
        functools.partial(_conv_stats_kernel, TH=TH, kH=kH, H=H),
        grid=grid,
        in_specs=[xa_spec, xb_spec, w_spec],
        out_specs=pl.BlockSpec((1, 1, 2, NP), lambda n, r: (n, r, 0, 0)),
        out_shape=jax.ShapeDtypeStruct((N, R, 2, NP), jnp.float32),
        compiler_params=cparams,
    )(xp, xp, B)

    # ---- tiny per-channel glue: Chan-combine partials -> folded scale/shift ----
    s_part = stats[:, :, 0, :WC].reshape(N, R, W, Cout)
    m2_part = stats[:, :, 1, :WC].reshape(N, R, W, Cout)
    cnt = jnp.minimum(TH, H - jnp.arange(R) * TH).astype(jnp.float32)
    cnt = cnt[None, :, None, None]
    total = float(N * H * W)
    mean_c = jnp.sum(s_part, axis=(0, 1, 2)) / total
    var_c = jnp.sum(m2_part + cnt * (s_part / cnt - mean_c) ** 2,
                    axis=(0, 1, 2)) / total
    inv = jax.lax.rsqrt(var_c + eps)
    scale_c = gamma.astype(jnp.float32) * inv
    shift_c = beta.astype(jnp.float32) - mean_c * scale_c
    scale_l = jnp.pad(jnp.tile(scale_c, W), (0, NP - WC))            # lane = x*Cout+co
    shift_l = jnp.pad(jnp.tile(shift_c, W), (0, NP - WC))
    st = jnp.stack([scale_l, shift_l], axis=0)                       # (2, NP) f32

    # ---- pass 2: recompute conv tile, folded BN + ReLU, lane-dense bf16 store ----
    out = pl.pallas_call(
        functools.partial(_conv_bn_relu_kernel, TH=TH, kH=kH),
        grid=grid,
        in_specs=[xa_spec, xb_spec, w_spec,
                  pl.BlockSpec((2, NP), lambda n, r: (0, 0))],
        out_specs=pl.BlockSpec((1, TH, NP), lambda n, r: (n, r, 0)),
        out_shape=jax.ShapeDtypeStruct((N, R * TH, NP), jnp.bfloat16),
        compiler_params=cparams,
    )(xp, xp, B, st)

    out = out[:, :H, :WC].reshape(N, H, W, Cout).astype(jnp.float32)
    return jnp.transpose(out, (0, 3, 1, 2))                          # back to NCHW


def _reference(x, weight, bias, gamma, beta, eps=1e-5):
    """Pure-JAX f32 reference: Conv2d('same' pad) + training-mode BatchNorm2d + ReLU."""
    kH, kW = weight.shape[2], weight.shape[3]
    ph, pw = (kH - 1) // 2, (kW - 1) // 2
    conv = jax.lax.conv_general_dilated(
        x, weight, window_strides=(1, 1),
        padding=((ph, ph), (pw, pw)),
        dimension_numbers=("NCHW", "OIHW", "NCHW"))
    conv = conv + bias[None, :, None, None]
    mean = conv.mean(axis=(0, 2, 3), keepdims=True)
    var = ((conv - mean) ** 2).mean(axis=(0, 2, 3), keepdims=True)
    y = (conv - mean) * jax.lax.rsqrt(var + eps)
    y = y * gamma[None, :, None, None] + beta[None, :, None, None]
    return jnp.maximum(y, 0.0)


if __name__ == "__main__":
    # ConvolutionLayer(infilters=4, outfilters=8, kernal_size=3) on a small input.
    N, Cin, Cout, H, W, K = 2, 4, 8, 16, 16, 3

    key = jax.random.PRNGKey(0)
    kx, kw, kb = jax.random.split(key, 3)

    x = jax.random.normal(kx, (N, Cin, H, W), dtype=jnp.float32)

    # Deterministic param init (PyTorch-style uniform bounds for Conv2d).
    fan_in = Cin * K * K
    bound = float(fan_in) ** -0.5
    weight = jax.random.uniform(kw, (Cout, Cin, K, K), jnp.float32, -bound, bound)
    bias = jax.random.uniform(kb, (Cout,), jnp.float32, -bound, bound)
    gamma = jnp.ones((Cout,), jnp.float32)   # BatchNorm2d default weight
    beta = jnp.zeros((Cout,), jnp.float32)   # BatchNorm2d default bias

    # The kernel feeds the MXU bf16 operands.  Pre-round the conv operands to
    # bf16 so the f32 reference sees identical values and the comparison
    # isolates kernel correctness.
    x_q = x.astype(jnp.bfloat16).astype(jnp.float32)
    w_q = weight.astype(jnp.bfloat16).astype(jnp.float32)

    out = convolution_layer_forward(x_q, w_q, bias, gamma, beta)
    out = jax.block_until_ready(out)

    ref = _reference(x_q, w_q, bias, gamma, beta)
    assert out.shape == (N, Cout, H, W), out.shape
    max_err = float(jnp.max(jnp.abs(out - ref)))
    # Output is stored in bf16 (per perf review) -> ~0.2% relative error budget.
    assert jnp.allclose(out, ref, atol=2e-2, rtol=2e-2), max_err

    print("KERNEL_OK")
</pallas_src>

<mosaic_0001>
module attributes {stable_mosaic.version = 11 : i64} {
  func.func @_conv_stats_kernel(%arg0: i32, %arg1: i32, %arg2: memref<1x8x128xbf16, #tpu.memory_space<vmem>>, %arg3: memref<1x8x128xbf16, #tpu.memory_space<vmem>>, %arg4: memref<3x128x128xbf16, #tpu.memory_space<vmem>>, %arg5: memref<1x1x2x128xf32, #tpu.memory_space<vmem>>) attributes {dimension_semantics = [#tpu.dimension_semantics<parallel>, #tpu.dimension_semantics<parallel>], iteration_bounds = array<i64: 2, 2>, scalar_prefetch = 0 : i64, scratch_operands = 0 : i64, tpu.core_type = #tpu.core_type<tc>, window_params = [{transform_indices = @transform_0, window_bounds = array<i64: 1, 8, 128>}, {transform_indices = @transform_1, window_bounds = array<i64: 1, 8, 128>}, {pipeline_mode = #tpu.pipeline_mode<synchronous>, transform_indices = @transform_2, window_bounds = array<i64: 3, 128, 128>}, {transform_indices = @transform_3, window_bounds = array<i64: 1, 1, 2, 128>}]} {
    %c0 = arith.constant 0 : index
    %c0_0 = arith.constant 0 : index
    %c0_1 = arith.constant 0 : index
    %0 = vector.load %arg2[%c0, %c0_0, %c0_1] : memref<1x8x128xbf16, #tpu.memory_space<vmem>>, vector<1x8x128xbf16>
    %1 = vector.shape_cast %0 : vector<1x8x128xbf16> to vector<8x128xbf16>
    %c0_2 = arith.constant 0 : index
    %c0_3 = arith.constant 0 : index
    %c0_4 = arith.constant 0 : index
    %2 = vector.load %arg3[%c0_2, %c0_3, %c0_4] : memref<1x8x128xbf16, #tpu.memory_space<vmem>>, vector<1x2x128xbf16>
    %3 = vector.shape_cast %2 : vector<1x2x128xbf16> to vector<2x128xbf16>
    %4 = tpu.concatenate %1, %3 in 0 : vector<8x128xbf16>, vector<2x128xbf16> -> vector<10x128xbf16>
    %5 = vector.extract_strided_slice %4 {offsets = [0, 0], sizes = [8, 128], strides = [1, 1]} : vector<10x128xbf16> to vector<8x128xbf16>
    %c0_5 = arith.constant 0 : index
    %c0_6 = arith.constant 0 : index
    %c0_7 = arith.constant 0 : index
    %6 = vector.load %arg4[%c0_5, %c0_6, %c0_7] : memref<3x128x128xbf16, #tpu.memory_space<vmem>>, vector<1x128x128xbf16>
    %7 = vector.shape_cast %6 : vector<1x128x128xbf16> to vector<128x128xbf16>
    %cst = arith.constant dense<0.000000e+00> : vector<8x128xf32>
    %8 = tpu.matmul %5, %7, %cst {dimension_numbers = #tpu.dot_dimension_numbers<[1], [0], [0], [1], [0, 0, 1, 1], [], []>} : vector<8x128xbf16>, vector<128x128xbf16>, vector<8x128xf32> -> vector<8x128xf32>
    %9 = vector.extract_strided_slice %4 {offsets = [1, 0], sizes = [8, 128], strides = [1, 1]} : vector<10x128xbf16> to vector<8x128xbf16>
    %c1 = arith.constant 1 : index
    %c0_8 = arith.constant 0 : index
    %c0_9 = arith.constant 0 : index
    %10 = vector.load %arg4[%c1, %c0_8, %c0_9] : memref<3x128x128xbf16, #tpu.memory_space<vmem>>, vector<1x128x128xbf16>
    %11 = vector.shape_cast %10 : vector<1x128x128xbf16> to vector<128x128xbf16>
    %cst_10 = arith.constant dense<0.000000e+00> : vector<8x128xf32>
    %12 = tpu.matmul %9, %11, %cst_10 {dimension_numbers = #tpu.dot_dimension_numbers<[1], [0], [0], [1], [0, 0, 1, 1], [], []>} : vector<8x128xbf16>, vector<128x128xbf16>, vector<8x128xf32> -> vector<8x128xf32>
    %13 = arith.addf %8, %12 : vector<8x128xf32>
    %14 = vector.extract_strided_slice %4 {offsets = [2, 0], sizes = [8, 128], strides = [1, 1]} : vector<10x128xbf16> to vector<8x128xbf16>
    %c2 = arith.constant 2 : index
    %c0_11 = arith.constant 0 : index
    %c0_12 = arith.constant 0 : index
    %15 = vector.load %arg4[%c2, %c0_11, %c0_12] : memref<3x128x128xbf16, #tpu.memory_space<vmem>>, vector<1x128x128xbf16>
    %16 = vector.shape_cast %15 : vector<1x128x128xbf16> to vector<128x128xbf16>
    %cst_13 = arith.constant dense<0.000000e+00> : vector<8x128xf32>
    %17 = tpu.matmul %14, %16, %cst_13 {dimension_numbers = #tpu.dot_dimension_numbers<[1], [0], [0], [1], [0, 0, 1, 1], [], []>} : vector<8x128xbf16>, vector<128x128xbf16>, vector<8x128xf32> -> vector<8x128xf32>
    %18 = arith.addf %13, %17 : vector<8x128xf32>
    %c8_i32 = arith.constant 8 : i32
    %19 = arith.muli %arg1, %c8_i32 : i32
    %20 = tpu.iota {dimensions = array<i32: 0>} : vector<8x1xi32>
    %21 = vector.broadcast %19 : i32 to vector<8x1xi32>
    %22 = arith.addi %21, %20 : vector<8x1xi32>
    %c16_i32 = arith.constant 16 : i32
    %23 = vector.broadcast %c16_i32 : i32 to vector<8x1xi32>
    %24 = arith.cmpi slt, %22, %23 : vector<8x1xi32>
    %25 = arith.extui %24 : vector<8x1xi1> to vector<8x1xi32>
    %26 = arith.sitofp %25 : vector<8x1xi32> to vector<8x1xf32>
    %c16_i32_14 = arith.constant 16 : i32
    %27 = arith.subi %c16_i32_14, %19 : i32
    %c8_i32_15 = arith.constant 8 : i32
    %28 = arith.minsi %c8_i32_15, %27 : i32
    %29 = arith.sitofp %28 : i32 to f32
    %30 = vector.broadcast %26 : vector<8x1xf32> to vector<8x128xf32>
    %31 = arith.mulf %18, %30 : vector<8x128xf32>
    %cst_16 = arith.constant dense<0.000000e+00> : vector<128xf32>
    %32 = vector.multi_reduction <add>, %31, %cst_16 [0] : vector<8x128xf32> to vector<128xf32>
    %33 = vector.shape_cast %32 : vector<128xf32> to vector<1x128xf32>
    %34 = vector.broadcast %29 : f32 to vector<1x128xf32>
    %35 = arith.divf %33, %34 : vector<1x128xf32>
    %36 = vector.broadcast %35 : vector<1x128xf32> to vector<8x128xf32>
    %37 = arith.subf %18, %36 : vector<8x128xf32>
    %38 = vector.broadcast %26 : vector<8x1xf32> to vector<8x128xf32>
    %39 = arith.mulf %37, %38 : vector<8x128xf32>
    %40 = arith.mulf %39, %39 : vector<8x128xf32>
    %cst_17 = arith.constant dense<0.000000e+00> : vector<128xf32>
    %41 = vector.multi_reduction <add>, %40, %cst_17 [0] : vector<8x128xf32> to vector<128xf32>
    %42 = vector.shape_cast %41 : vector<128xf32> to vector<1x128xf32>
    %43 = tpu.concatenate %33, %42 in 0 : vector<1x128xf32>, vector<1x128xf32> -> vector<2x128xf32>
    %44 = vector.shape_cast %43 : vector<2x128xf32> to vector<1x1x2x128xf32>
    %c0_18 = arith.constant 0 : index
    %c0_19 = arith.constant 0 : index
    %c0_20 = arith.constant 0 : index
    %c0_21 = arith.constant 0 : index
    %45 = vector.load %arg5[%c0_18, %c0_19, %c0_20, %c0_21] : memref<1x1x2x128xf32, #tpu.memory_space<vmem>>, vector<1x1x2x128xf32>
    tpu.vector_store %arg5[%c0_18, %c0_19, %c0_20, %c0_21], %44 {strides = array<i32>} : memref<1x1x2x128xf32, #tpu.memory_space<vmem>>, vector<1x1x2x128xf32>,
    return
  }
  func.func @transform_0(%arg0: i32, %arg1: i32) -> (i32, i32, i32) {
    %c0_i32 = arith.constant 0 : i32
    %c0_i32_0 = arith.constant 0 : i32
    return %arg0, %arg1, %c0_i32 : i32, i32, i32
  }
  func.func @transform_1(%arg0: i32, %arg1: i32) -> (i32, i32, i32) {
    %c1_i32 = arith.constant 1 : i32
    %0 = arith.addi %arg1, %c1_i32 : i32
    %c0_i32 = arith.constant 0 : i32
    %c0_i32_0 = arith.constant 0 : i32
    return %arg0, %0, %c0_i32 : i32, i32, i32
  }
  func.func @transform_2(%arg0: i32, %arg1: i32) -> (i32, i32, i32) {
    %c0_i32 = arith.constant 0 : i32
    %c0_i32_0 = arith.constant 0 : i32
    %c0_i32_1 = arith.constant 0 : i32
    %c0_i32_2 = arith.constant 0 : i32
    return %c0_i32, %c0_i32_0, %c0_i32_1 : i32, i32, i32
  }
  func.func @transform_3(%arg0: i32, %arg1: i32) -> (i32, i32, i32, i32) {
    %c0_i32 = arith.constant 0 : i32
    %c0_i32_0 = arith.constant 0 : i32
    %c0_i32_1 = arith.constant 0 : i32
    return %arg0, %arg1, %c0_i32, %c0_i32_0 : i32, i32, i32, i32
  }
}

module attributes {stable_mosaic.version = 11 : i64} {
  func.func @_conv_bn_relu_kernel(%arg0: i32, %arg1: i32, %arg2: memref<1x8x128xbf16, #tpu.memory_space<vmem>>, %arg3: memref<1x8x128xbf16, #tpu.memory_space<vmem>>, %arg4: memref<3x128x128xbf16, #tpu.memory_space<vmem>>, %arg5: memref<2x128xf32, #tpu.memory_space<vmem>>, %arg6: memref<1x8x128xbf16, #tpu.memory_space<vmem>>) attributes {dimension_semantics = [#tpu.dimension_semantics<parallel>, #tpu.dimension_semantics<parallel>], iteration_bounds = array<i64: 2, 2>, scalar_prefetch = 0 : i64, scratch_operands = 0 : i64, tpu.core_type = #tpu.core_type<tc>, window_params = [{transform_indices = @transform_0, window_bounds = array<i64: 1, 8, 128>}, {transform_indices = @transform_1, window_bounds = array<i64: 1, 8, 128>}, {pipeline_mode = #tpu.pipeline_mode<synchronous>, transform_indices = @transform_2, window_bounds = array<i64: 3, 128, 128>}, {pipeline_mode = #tpu.pipeline_mode<synchronous>, transform_indices = @transform_3, window_bounds = array<i64: 2, 128>}, {transform_indices = @transform_4, window_bounds = array<i64: 1, 8, 128>}]} {
    %c0 = arith.constant 0 : index
    %c0_0 = arith.constant 0 : index
    %c0_1 = arith.constant 0 : index
    %0 = vector.load %arg2[%c0, %c0_0, %c0_1] : memref<1x8x128xbf16, #tpu.memory_space<vmem>>, vector<1x8x128xbf16>
    %1 = vector.shape_cast %0 : vector<1x8x128xbf16> to vector<8x128xbf16>
    %c0_2 = arith.constant 0 : index
    %c0_3 = arith.constant 0 : index
    %c0_4 = arith.constant 0 : index
    %2 = vector.load %arg3[%c0_2, %c0_3, %c0_4] : memref<1x8x128xbf16, #tpu.memory_space<vmem>>, vector<1x2x128xbf16>
    %3 = vector.shape_cast %2 : vector<1x2x128xbf16> to vector<2x128xbf16>
    %4 = tpu.concatenate %1, %3 in 0 : vector<8x128xbf16>, vector<2x128xbf16> -> vector<10x128xbf16>
    %5 = vector.extract_strided_slice %4 {offsets = [0, 0], sizes = [8, 128], strides = [1, 1]} : vector<10x128xbf16> to vector<8x128xbf16>
    %c0_5 = arith.constant 0 : index
    %c0_6 = arith.constant 0 : index
    %c0_7 = arith.constant 0 : index
    %6 = vector.load %arg4[%c0_5, %c0_6, %c0_7] : memref<3x128x128xbf16, #tpu.memory_space<vmem>>, vector<1x128x128xbf16>
    %7 = vector.shape_cast %6 : vector<1x128x128xbf16> to vector<128x128xbf16>
    %cst = arith.constant dense<0.000000e+00> : vector<8x128xf32>
    %8 = tpu.matmul %5, %7, %cst {dimension_numbers = #tpu.dot_dimension_numbers<[1], [0], [0], [1], [0, 0, 1, 1], [], []>} : vector<8x128xbf16>, vector<128x128xbf16>, vector<8x128xf32> -> vector<8x128xf32>
    %9 = vector.extract_strided_slice %4 {offsets = [1, 0], sizes = [8, 128], strides = [1, 1]} : vector<10x128xbf16> to vector<8x128xbf16>
    %c1 = arith.constant 1 : index
    %c0_8 = arith.constant 0 : index
    %c0_9 = arith.constant 0 : index
    %10 = vector.load %arg4[%c1, %c0_8, %c0_9] : memref<3x128x128xbf16, #tpu.memory_space<vmem>>, vector<1x128x128xbf16>
    %11 = vector.shape_cast %10 : vector<1x128x128xbf16> to vector<128x128xbf16>
    %cst_10 = arith.constant dense<0.000000e+00> : vector<8x128xf32>
    %12 = tpu.matmul %9, %11, %cst_10 {dimension_numbers = #tpu.dot_dimension_numbers<[1], [0], [0], [1], [0, 0, 1, 1], [], []>} : vector<8x128xbf16>, vector<128x128xbf16>, vector<8x128xf32> -> vector<8x128xf32>
    %13 = arith.addf %8, %12 : vector<8x128xf32>
    %14 = vector.extract_strided_slice %4 {offsets = [2, 0], sizes = [8, 128], strides = [1, 1]} : vector<10x128xbf16> to vector<8x128xbf16>
    %c2 = arith.constant 2 : index
    %c0_11 = arith.constant 0 : index
    %c0_12 = arith.constant 0 : index
    %15 = vector.load %arg4[%c2, %c0_11, %c0_12] : memref<3x128x128xbf16, #tpu.memory_space<vmem>>, vector<1x128x128xbf16>
    %16 = vector.shape_cast %15 : vector<1x128x128xbf16> to vector<128x128xbf16>
    %cst_13 = arith.constant dense<0.000000e+00> : vector<8x128xf32>
    %17 = tpu.matmul %14, %16, %cst_13 {dimension_numbers = #tpu.dot_dimension_numbers<[1], [0], [0], [1], [0, 0, 1, 1], [], []>} : vector<8x128xbf16>, vector<128x128xbf16>, vector<8x128xf32> -> vector<8x128xf32>
    %18 = arith.addf %13, %17 : vector<8x128xf32>
    %c0_14 = arith.constant 0 : index
    %c0_15 = arith.constant 0 : index
    %19 = vector.load %arg5[%c0_14, %c0_15] : memref<2x128xf32, #tpu.memory_space<vmem>>, vector<1x128xf32>
    %20 = vector.broadcast %19 : vector<1x128xf32> to vector<8x128xf32>
    %21 = arith.mulf %18, %20 : vector<8x128xf32>
    %c1_16 = arith.constant 1 : index
    %c0_17 = arith.constant 0 : index
    %22 = vector.load %arg5[%c1_16, %c0_17] : memref<2x128xf32, #tpu.memory_space<vmem>>, vector<1x128xf32>
    %23 = vector.broadcast %22 : vector<1x128xf32> to vector<8x128xf32>
    %24 = arith.addf %21, %23 : vector<8x128xf32>
    %cst_18 = arith.constant 0.000000e+00 : f32
    %25 = vector.broadcast %cst_18 : f32 to vector<8x128xf32>
    %26 = arith.maximumf %24, %25 : vector<8x128xf32>
    %27 = arith.truncf %26 : vector<8x128xf32> to vector<8x128xbf16>
    %28 = vector.shape_cast %27 : vector<8x128xbf16> to vector<1x8x128xbf16>
    %c0_19 = arith.constant 0 : index
    %c0_20 = arith.constant 0 : index
    %c0_21 = arith.constant 0 : index
    %29 = vector.load %arg6[%c0_19, %c0_20, %c0_21] : memref<1x8x128xbf16, #tpu.memory_space<vmem>>, vector<1x8x128xbf16>
    tpu.vector_store %arg6[%c0_19, %c0_20, %c0_21], %28 {strides = array<i32>} : memref<1x8x128xbf16, #tpu.memory_space<vmem>>, vector<1x8x128xbf16>,
    return
  }
  func.func @transform_0(%arg0: i32, %arg1: i32) -> (i32, i32, i32) {
    %c0_i32 = arith.constant 0 : i32
    %c0_i32_0 = arith.constant 0 : i32
    return %arg0, %arg1, %c0_i32 : i32, i32, i32
  }
  func.func @transform_1(%arg0: i32, %arg1: i32) -> (i32, i32, i32) {
    %c1_i32 = arith.constant 1 : i32
    %0 = arith.addi %arg1, %c1_i32 : i32
    %c0_i32 = arith.constant 0 : i32
    %c0_i32_0 = arith.constant 0 : i32
    return %arg0, %0, %c0_i32 : i32, i32, i32
  }
  func.func @transform_2(%arg0: i32, %arg1: i32) -> (i32, i32, i32) {
    %c0_i32 = arith.constant 0 : i32
    %c0_i32_0 = arith.constant 0 : i32
    %c0_i32_1 = arith.constant 0 : i32
    %c0_i32_2 = arith.constant 0 : i32
    return %c0_i32, %c0_i32_0, %c0_i32_1 : i32, i32, i32
  }
  func.func @transform_3(%arg0: i32, %arg1: i32) -> (i32, i32) {
    %c0_i32 = arith.constant 0 : i32
    %c0_i32_0 = arith.constant 0 : i32
    %c0_i32_1 = arith.constant 0 : i32
    return %c0_i32, %c0_i32_0 : i32, i32
  }
  func.func @transform_4(%arg0: i32, %arg1: i32) -> (i32, i32, i32) {
    %c0_i32 = arith.constant 0 : i32
    %c0_i32_0 = arith.constant 0 : i32
    return %arg0, %arg1, %c0_i32 : i32, i32, i32
  }
}

</mosaic_0001>

<bundles_post_ra>
// kernel: convolution_layer_forward.2
= control target key start
LH: loop header
LB: loop body
LE: loop exit
PB: predicated region body
PF: predicated region fallthrough
CT: control target
= control target key end

     0   :  { %s915_s12 = smov 0   ;;  %s917_s13 = smov 0   ;;  %s1053_s0 = inlined_call_operand.vmem [shape: bf16[2,24,128], index: 0, kind: input, shape index: {}, may-alias: {0,1}]   ;;  %s1054_s1 = inlined_call_operand.vmem [shape: bf16[2,24,128], index: 1, kind: input, shape index: {}, may-alias: {0,1}]   ;;  %s1055_s2 = inlined_call_operand.vmem [shape: bf16[3,128,128], index: 2, kind: input, shape index: {}]   ;;  %s1056_s3 = inlined_call_operand.vmem [shape: f32[2,2,2,128], index: 3, kind: output, shape index: {}]  }
   0x1   :  { %s919_s14 = smov 0   ;;  %s921_s15 = smov 0  }
   0x2   :  { %s923_s16 = smov 0  }
   0x3 LB: > { %s22_s17 = sadd.s32 1, %s884_s14  ;;  %s25_s18 = sadd.s32 1, %s888_s15  ;;  %s892_s16 = sphi %s923_s16, %s13_s16   ;;  %s888_s15 = sphi %s921_s15, %s1060_s15   ;;  %s884_s14 = sphi %s919_s14, %s1059_s14   ;;  %s880_s13 = sphi %s917_s13, %s1058_s13   ;;  %s876_s12 = sphi %s915_s12, %s1057_s12  }
   0x4   : > { %p23_p0 = scmp.ge.s32.totalorder %s22_s17, 2  ;;  %p649_p1 = scmp.ge.s32.totalorder %s892_s16, 1 }
   0x5   : > { %p175_p2 = scmp.lt.s32.totalorder %s892_s16, 5 }
   0x6   : > { %s1062_s17 = smov (%p23_p0, %s22_s17), 0  ;;  %s1064_s18 = smov (!%p23_p0, %s25_s18), %s888_s15 }
   0x7   : > { %p176_p3 = pnand %p649_p1, %p175_p2  ;;  %p27_p4 = scmp.ge.s32.totalorder %s1064_s18, 2 }
   0x8   : > { %p214_p5 = scmp.lt.s32.totalorder (!%p176_p3), %s880_s13, 1  ;;  %p216_p6 = scmp.lt.s32.totalorder (!%p176_p3), %s876_s12, 2 }
   0x9   : > { %s1066_s18 = smov (%p27_p4, %s1064_s18), 0  ;;  %179 = sbr.rel (%p176_p3) target bundleno = 218 (0xda), region = 32 }
   0xa   : > { %s222_s25 = sadd.s32 (!%p176_p3), 1, %s876_s12  ;;  %p234_p9 = scmp.lt.s32.totalorder (!%p176_p3), %s876_s12, 1 }
   0xb   : > { %p225_p7 = scmp.lt.s32.totalorder (!%p176_p3), %s222_s25, 2 }
   0xe   : > { %v801_v0 = vld [vmem:[%s1055_s2 + $0x78] sm:$0xff]  ;;  %v800_v3 = vld [vmem:[%s1055_s2 + $0x70] sm:$0xff]  ;;  %s1068_s13 = smov (!%p214_p5, %s880_s13), 1  ;;  %v799_v6 = vld [vmem:[%s1055_s2 + $0x68] sm:$0xff]  ;;  %s1070_s25 = smov (!%p225_p7, %s222_s25), 2  ;;  %vm245_vm0 = vcmask 1043456   ;;  %v495_v35 = vlaneseq }
   0xf   : > { %v793_v1 = vld [vmem:[%s1055_s2 + $0x38] sm:$0xff]  ;;  %338 = vmatpush.bf16.msra.mxu0 %v801_v0  ;;  %v792_v4 = vld [vmem:[%s1055_s2 + $0x30] sm:$0xff]  ;;  %s217_s5 = scalar_select %p216_p6, %s876_s12, 2  ;;  %v791_v7 = vld [vmem:[%s1055_s2 + $0x28] sm:$0xff]  ;;  %v894_v46 = vmov 0.0   ;;  %vm538_vm6 = vcmask 1040384  }
  0x10   : > { %v809_v2 = vld [vmem:[%s1055_s2 + $0xb8] sm:$0xff]  ;;  %399 = vmatpush.bf16.msra.mxu1 %v793_v1  ;;  %v808_v5 = vld [vmem:[%s1055_s2 + $0xb0] sm:$0xff]  ;;  %s810_s6 = smul.u32 3, %s1068_s13  ;;  %v807_v8 = vld [vmem:[%s1055_s2 + $0xa8] sm:$0xff]  ;;  %v496_v36 = vshrl.u32 %v495_v35, 7  ;;  %s652_s23 = sshll.u32 %s1068_s13, 1 }
  0x11   : > { %480 = vmatpush.bf16.msra.mxu2 %v809_v2  ;;  %v798_v9 = vld [vmem:[%s1055_s2 + $0x60] sm:$0xff]  ;;  %v797_v12 = vld [vmem:[%s1055_s2 + $0x58] sm:$0xff]  ;;  %v796_v19 = vld [vmem:[%s1055_s2 + $0x50] sm:$0xff] }
  0x12   : > { %s219_s20 = sadd.s32 %s810_s6, %s217_s5  ;;  %v790_v10 = vld [vmem:[%s1055_s2 + $0x20] sm:$0xff]  ;;  %s228_s29 = sadd.s32 %s810_s6, %s1070_s25  ;;  %v789_v13 = vld [vmem:[%s1055_s2 + $0x18] sm:$0xff]  ;;  %v788_v20 = vld [vmem:[%s1055_s2 + $0x10] sm:$0xff] }
  0x13   : > { %339 = vmatpush.bf16.msra.mxu0 %v800_v3  ;;  %s650_s26 = sshll.u32 %s219_s20, 2  ;;  %v806_v11 = vld [vmem:[%s1055_s2 + $0xa0] sm:$0xff]  ;;  %s651_s30 = sshll.u32 %s228_s29, 2  ;;  %v805_v15 = vld [vmem:[%s1055_s2 + $0x98] sm:$0xff]  ;;  %v804_v21 = vld [vmem:[%s1055_s2 + $0x90] sm:$0xff] }
  0x14   : > { %400 = vmatpush.bf16.msra.mxu1 %v792_v4  ;;  %s221_s7 = scalar_lea.vmem %s1053_s0, %s650_s26  ;;  %s230_s10 = scalar_lea.vmem %s1054_s1, %s651_s30  ;;  %v795_v24 = vld [vmem:[%s1055_s2 + $0x48] sm:$0xff]  ;;  %v794_v29 = vld [vmem:[%s1055_s2 + $0x40] sm:$0xff] }
  0x15   : > { %481 = vmatpush.bf16.msra.mxu2 %v808_v5  ;;  %v241_v14 = vld [vmem:[%s230_s10] sm:$0x1]  ;;  %v787_v25 = vld [vmem:[%s1055_s2 + $0x8] sm:$0xff]  ;;  %s782_s25 = sshll.u32 %s876_s12, 3  ;;  %s1074_s12 = smov (!%p234_p9, %s876_s12), 1 }
  0x16   : > { %v243_v16 = vunpack.c.l.b16 %v241_v14  ;;  %v240_v17 = vld [vmem:[%s221_s7] sm:$0xf]  ;;  %v803_v26 = vld [vmem:[%s1055_s2 + $0x88] sm:$0xff]  ;;  %s502_s6 = ssub.s32 16, %s782_s25  ;;  %v497_v37 = vstv %s782_s25  ;;  %s237_s24 = sadd.s32 %s652_s23, %s1074_s12 }
  0x17   : > { %340 = vmatpush.bf16.msra.mxu0 %v799_v6  ;;  %v786_v30 = vld [vmem:[%s1055_s2] sm:$0xff]  ;;  %p503_p8 = scmp.lt.s32.totalorder %s502_s6, 8  ;;  %v498_v41 = vadd.s32 %v497_v37, %v496_v36  ;;  %s653_s26 = sshll.u32 %s237_s24, 1 }
  0x18   : > { %401 = vmatpush.bf16.msra.mxu1 %v791_v7  ;;  %v244_v18 = vpack.c.b16 %v243_v16, %v243_v16  ;;  %v802_v31 = vld [vmem:[%s1055_s2 + $0x80] sm:$0xff]  ;;  %s239_s29 = scalar_lea.vmem %s1056_s3, %s653_s26 }
  0x19   : > { %482 = vmatpush.bf16.msra.mxu2 %v807_v8  ;;  %s1072_s6 = smov (!%p503_p8, %s502_s6), 8  ;;  %vm499_vm1 = vcmp.lt.s32.totalorder %v498_v41, 16 }
  0x1a   : > { %v248_v22 = vsel %vm245_vm0, %v240_v17, %v244_v18  ;;  %s505_s22 = scvt.s32.f32 %s1072_s6  ;;  %v783_v47 = vsel %vm499_vm1, 1.0, %v894_v46 }
  0x1b   : > { %341 = vmatpush.bf16.msra.mxu0 %v798_v9  ;;  %v285_v23 = vshll.u32 %v248_v22, 16  ;;  %v283_v27 = vshrl.u32 %v248_v22, 16  ;;  %v430_v33 = vrot.slane %v248_v22, 1 }
  0x1c   : > { %402 = vmatpush.bf16.msra.mxu1 %v790_v10  ;;  %v513_v34 = vstv %s505_s22 }
  0x1d   : > { %483 = vmatpush.bf16.msra.mxu2 %v806_v11  ;;  %v287_v28 = vrot.slane %v285_v23, 1  ;;  %852 = vrcp.f32 %v513_v34  ;;  %vm519_vm2 = vweird.f32 %v513_v34  ;;  %v525_v54 = vand.u32 2147483648, %v513_v34 }
  0x1e   : > { %v523_v57 = vand.u32 2147483647, %v513_v34 }
  0x1f   : > { %342 = vmatpush.bf16.msra.mxu0 %v797_v12  ;;  %v288_v32 = vor.u32 %v287_v28, %v283_v27  ;;  %v526_v60 = vor.u32 1.1754944e-38, %v525_v54 }
  0x20   : > { %403 = vmatpush.bf16.msra.mxu1 %v789_v13  ;;  %vm524_vm5 = vcmp.eq.f32.partialorder %v523_v57, 8.507059e+37 }
  0x21   : > { %484 = vmatpush.bf16.msra.mxu2 %v805_v15 }
  0x23   : > { %343 = vmatpush.bf16.msra.mxu0 %v796_v19  ;;  %v853_v38 = vpop.eup %852 }
  0x24   : > { %404 = vmatpush.bf16.msra.mxu1 %v788_v20  ;;  %v515_v42 = vmul.f32 %v853_v38, %v513_v34  ;;  %vm520_vm3 = vweird.f32 %v853_v38 }
  0x25   : > { %485 = vmatpush.bf16.msra.mxu2 %v804_v21  ;;  %vm521_vm4 = vmor %vm519_vm2, %vm520_vm3 }
  0x26   : > { %v516_v44 = vsub.f32 1.0, %v515_v42 }
  0x27   : > { %344 = vmatpush.bf16.msra.mxu0 %v795_v24 }
  0x28   : > { %405 = vmatpush.bf16.msra.mxu1 %v787_v25  ;;  %v517_v52 = vmul.f32 %v853_v38, %v516_v44 }
  0x29   : > { %486 = vmatpush.bf16.msra.mxu2 %v803_v26 }
  0x2a   : > { %v518_v56 = vadd.f32 %v853_v38, %v517_v52 }
  0x2b   : > { %345 = vmatpush.bf16.msra.mxu0 %v794_v29 }
  0x2c   : > { %406 = vmatpush.bf16.msra.mxu1 %v786_v30  ;;  %v522_v62 = vsel %vm521_vm4, %v853_v38, %v518_v56 }
  0x2d   : > { %487 = vmatpush.bf16.msra.mxu2 %v802_v31  ;;  %v527_v0 = vsel %vm524_vm5, %v526_v60, %v522_v62 }
  0x2e   : > { %346 = vmatmul.bf16.vlgmr.msra.gmra.mxu0 %v288_v32 }
  0x2f   : > { %407 = vmatmul.bf16.vlgmr.msra.gmra.mxu1 %v248_v22 }
  0x30   : > { %488 = vmatmul.bf16.vlgmr.msra.gmra.mxu2 %v430_v33 }
  0xab   : > { %v347_v39 = vpop.f32.mrf.mxu0 }
  0xac   : > { %v408_v40 = vpop.f32.mrf.mxu1 }
  0xad   : > { %v409_v43 = vadd.f32 %v408_v40, %v347_v39 }
  0xb3   : > { %v489_v45 = vpop.f32.mrf.mxu2  ;;  %v349_v49 = vpop.f32.mrf.mxu0 }
  0xb4   : > { %v493_v48 = vadd.f32 %v489_v45, %v409_v43  ;;  %v410_v50 = vpop.f32.mrf.mxu1 }
  0xb6   : > { %v506_v51 = vmul.f32 %v783_v47, %v493_v48 }
  0xb8   : > { %v507_v53 = vrot.slane %v506_v51, 4 }
  0xba   : > { %v508_v55 = vadd.f32 %v507_v53, %v506_v51 }
  0xbb   : > { %v491_v58 = vpop.f32.mrf.mxu2 }
  0xbc   : > { %v509_v59 = vrot.slane %v508_v55, 2 }
  0xbe   : > { %v510_v61 = vadd.f32 %v509_v59, %v508_v55 }
  0xc0   : > { %v511_v63 = vrot.slane %v510_v61, 1 }
  0xc2   : > { %v512_v1 = vadd.f32 %v511_v63, %v510_v61 }
  0xc4   : > { %v528_v2 = vmul.f32 %v527_v0, %v512_v1 }
  0xc6   : > { %v529_v3 = vsub.f32 %v493_v48, %v528_v2 }
  0xc8   : > { %v530_v4 = vmul.f32 %v783_v47, %v529_v3 }
  0xca   : > { %v531_v5 = vmul.f32 %v530_v4, %v530_v4 }
  0xcc   : > { %v532_v6 = vrot.slane %v531_v5, 4 }
  0xce   : > { %v533_v7 = vadd.f32 %v532_v6, %v531_v5 }
  0xd0   : > { %v534_v8 = vrot.slane %v533_v7, 2 }
  0xd2   : > { %v535_v9 = vadd.f32 %v534_v8, %v533_v7 }
  0xd4   : > { %v536_v10 = vrot.slane %v535_v9, 1 }
  0xd6   : > { %v537_v11 = vadd.f32 %v536_v10, %v535_v9 }
  0xd8   : > { %v539_v12 = vsel %vm538_vm6, %v512_v1, %v537_v11 }
  0xd9   : > { %540 = vst [vmem:[%s239_s29] sm:$0x3] %v539_v12 }
  0xda PF: > { %s13_s16 = sadd.s32 1, %s892_s16   ;;  %s1057_s12 = smov %s884_s14 }
  0xdb   : > { %p10_p10 = scmp.ge.s32.totalorder %s13_s16, 6   ;;  %s1058_s13 = smov %s888_s15 }
  0xdc   : > { %s1059_s14 = smov %s1062_s17  ;;  %s1060_s15 = smov %s1066_s18 }
  0xdd   :  { %12 = sbr.rel (!%p10_p10) target bundleno = 3 (0x3), region = 67 }

// kernel: convolution_layer_forward.3
= control target key start
LH: loop header
LB: loop body
LE: loop exit
PB: predicated region body
PF: predicated region fallthrough
CT: control target
= control target key end

     0   :  { %s905_s15 = smov 0   ;;  %s907_s16 = smov 0   ;;  %s1048_s0 = inlined_call_operand.vmem [shape: bf16[2,24,128], index: 0, kind: input, shape index: {}, may-alias: {0,1}]   ;;  %s1049_s1 = inlined_call_operand.vmem [shape: bf16[2,24,128], index: 1, kind: input, shape index: {}, may-alias: {0,1}]   ;;  %s1050_s2 = inlined_call_operand.vmem [shape: bf16[3,128,128], index: 2, kind: input, shape index: {}]   ;;  %s1051_s3 = inlined_call_operand.vmem [shape: f32[2,128], index: 3, kind: input, shape index: {}]   ;;  %s1052_s4 = inlined_call_operand.vmem [shape: bf16[2,16,128], index: 4, kind: output, shape index: {}]  }
   0x1   :  { %s909_s17 = smov 0   ;;  %s911_s18 = smov 0  }
   0x2   :  { %s913_s19 = smov 0  }
   0x3 LB: > { %s23_s20 = sadd.s32 1, %s870_s17  ;;  %s26_s21 = sadd.s32 1, %s874_s18  ;;  %s878_s19 = sphi %s913_s19, %s14_s19   ;;  %s874_s18 = sphi %s911_s18, %s1056_s18   ;;  %s870_s17 = sphi %s909_s17, %s1055_s17   ;;  %s866_s16 = sphi %s907_s16, %s1054_s16   ;;  %s862_s15 = sphi %s905_s15, %s1053_s15  }
   0x4   : > { %p24_p0 = scmp.ge.s32.totalorder %s23_s20, 2  ;;  %p638_p1 = scmp.ge.s32.totalorder %s878_s19, 1 }
   0x5   : > { %p200_p2 = scmp.lt.s32.totalorder %s878_s19, 5 }
   0x6   : > { %s1058_s20 = smov (%p24_p0, %s23_s20), 0  ;;  %s1060_s21 = smov (!%p24_p0, %s26_s21), %s874_s18 }
   0x7   : > { %p201_p3 = pnand %p638_p1, %p200_p2  ;;  %p28_p4 = scmp.ge.s32.totalorder %s1060_s21, 2 }
   0x8   : > { %p241_p5 = scmp.lt.s32.totalorder (!%p201_p3), %s866_s16, 1  ;;  %p243_p6 = scmp.lt.s32.totalorder (!%p201_p3), %s862_s15, 2 }
   0x9   : > { %s1062_s21 = smov (%p28_p4, %s1060_s21), 0  ;;  %204 = sbr.rel (%p201_p3) target bundleno = 191 (0xbf), region = 36 }
   0xa   : > { %s249_s28 = sadd.s32 (!%p201_p3), 1, %s862_s15  ;;  %p261_p8 = scmp.lt.s32.totalorder (!%p201_p3), %s862_s15, 1 }
   0xb   : > { %p252_p7 = scmp.lt.s32.totalorder (!%p201_p3), %s249_s28, 2 }
   0xe   : > { %v788_v0 = vld [vmem:[%s1050_s2 + $0x78] sm:$0xff]  ;;  %v787_v3 = vld [vmem:[%s1050_s2 + $0x70] sm:$0xff]  ;;  %s1064_s16 = smov (!%p241_p5, %s866_s16), 1  ;;  %v786_v6 = vld [vmem:[%s1050_s2 + $0x68] sm:$0xff]  ;;  %s1066_s28 = smov (!%p252_p7, %s249_s28), 2  ;;  %vm272_vm0 = vcmask 1043456  }
   0xf   : > { %v780_v1 = vld [vmem:[%s1050_s2 + $0x38] sm:$0xff]  ;;  %365 = vmatpush.bf16.msra.mxu0 %v788_v0  ;;  %v779_v4 = vld [vmem:[%s1050_s2 + $0x30] sm:$0xff]  ;;  %s244_s9 = scalar_select %p243_p6, %s862_s15, 2  ;;  %v778_v7 = vld [vmem:[%s1050_s2 + $0x28] sm:$0xff] }
  0x10   : > { %v796_v2 = vld [vmem:[%s1050_s2 + $0xb8] sm:$0xff]  ;;  %426 = vmatpush.bf16.msra.mxu1 %v780_v1  ;;  %v795_v5 = vld [vmem:[%s1050_s2 + $0xb0] sm:$0xff]  ;;  %s797_s10 = smul.u32 3, %s1064_s16  ;;  %v794_v8 = vld [vmem:[%s1050_s2 + $0xa8] sm:$0xff]  ;;  %s1068_s15 = smov (!%p261_p8, %s862_s15), 1 }
  0x11   : > { %507 = vmatpush.bf16.msra.mxu2 %v796_v2  ;;  %v785_v9 = vld [vmem:[%s1050_s2 + $0x60] sm:$0xff]  ;;  %v784_v12 = vld [vmem:[%s1050_s2 + $0x58] sm:$0xff]  ;;  %v783_v19 = vld [vmem:[%s1050_s2 + $0x50] sm:$0xff] }
  0x12   : > { %s246_s24 = sadd.s32 %s797_s10, %s244_s9  ;;  %v777_v10 = vld [vmem:[%s1050_s2 + $0x20] sm:$0xff]  ;;  %s255_s7 = sadd.s32 %s797_s10, %s1066_s28  ;;  %v776_v13 = vld [vmem:[%s1050_s2 + $0x18] sm:$0xff]  ;;  %v775_v20 = vld [vmem:[%s1050_s2 + $0x10] sm:$0xff] }
  0x13   : > { %366 = vmatpush.bf16.msra.mxu0 %v787_v3  ;;  %s639_s30 = sshll.u32 %s246_s24, 2  ;;  %v793_v11 = vld [vmem:[%s1050_s2 + $0xa0] sm:$0xff]  ;;  %s640_s8 = sshll.u32 %s255_s7, 2  ;;  %v792_v15 = vld [vmem:[%s1050_s2 + $0x98] sm:$0xff]  ;;  %v791_v21 = vld [vmem:[%s1050_s2 + $0x90] sm:$0xff] }
  0x14   : > { %427 = vmatpush.bf16.msra.mxu1 %v779_v4  ;;  %s248_s12 = scalar_lea.vmem %s1048_s0, %s639_s30  ;;  %s257_s22 = scalar_lea.vmem %s1049_s1, %s640_s8  ;;  %v782_v24 = vld [vmem:[%s1050_s2 + $0x48] sm:$0xff]  ;;  %v781_v29 = vld [vmem:[%s1050_s2 + $0x40] sm:$0xff] }
  0x15   : > { %508 = vmatpush.bf16.msra.mxu2 %v795_v5  ;;  %v268_v14 = vld [vmem:[%s257_s22] sm:$0x1]  ;;  %v774_v25 = vld [vmem:[%s1050_s2 + $0x8] sm:$0xff]  ;;  %s641_s10 = sshll.u32 %s1064_s16, 1  ;;  %v839_v40 = vld [vmem:[%s1051_s3 + $0x1] ss:$0 sm:$0xff] }
  0x16   : > { %v270_v16 = vunpack.c.l.b16 %v268_v14  ;;  %v267_v17 = vld [vmem:[%s248_s12] sm:$0xf]  ;;  %v790_v26 = vld [vmem:[%s1050_s2 + $0x88] sm:$0xff]  ;;  %s264_s6 = sadd.s32 %s641_s10, %s1068_s15 }
  0x17   : > { %367 = vmatpush.bf16.msra.mxu0 %v786_v6  ;;  %v773_v30 = vld [vmem:[%s1050_s2] sm:$0xff]  ;;  %s642_s7 = sshll.u32 %s264_s6, 2 }
  0x18   : > { %428 = vmatpush.bf16.msra.mxu1 %v778_v7  ;;  %v271_v18 = vpack.c.b16 %v270_v16, %v270_v16  ;;  %v789_v31 = vld [vmem:[%s1050_s2 + $0x80] sm:$0xff]  ;;  %s266_s16 = scalar_lea.vmem %s1052_s4, %s642_s7 }
  0x19   : > { %509 = vmatpush.bf16.msra.mxu2 %v794_v8  ;;  %v838_v37 = vld [vmem:[%s1051_s3] ss:$0 sm:$0xff] }
  0x1a   : > { %v275_v22 = vsel %vm272_vm0, %v267_v17, %v271_v18 }
  0x1b   : > { %368 = vmatpush.bf16.msra.mxu0 %v785_v9  ;;  %v312_v23 = vshll.u32 %v275_v22, 16  ;;  %v310_v27 = vshrl.u32 %v275_v22, 16  ;;  %v457_v33 = vrot.slane %v275_v22, 1 }
  0x1c   : > { %429 = vmatpush.bf16.msra.mxu1 %v777_v10 }
  0x1d   : > { %510 = vmatpush.bf16.msra.mxu2 %v793_v11  ;;  %v314_v28 = vrot.slane %v312_v23, 1 }
  0x1f   : > { %369 = vmatpush.bf16.msra.mxu0 %v784_v12  ;;  %v315_v32 = vor.u32 %v314_v28, %v310_v27 }
  0x20   : > { %430 = vmatpush.bf16.msra.mxu1 %v776_v13 }
  0x21   : > { %511 = vmatpush.bf16.msra.mxu2 %v792_v15 }
  0x23   : > { %370 = vmatpush.bf16.msra.mxu0 %v783_v19 }
  0x24   : > { %431 = vmatpush.bf16.msra.mxu1 %v775_v20 }
  0x25   : > { %512 = vmatpush.bf16.msra.mxu2 %v791_v21 }
  0x27   : > { %371 = vmatpush.bf16.msra.mxu0 %v782_v24 }
  0x28   : > { %432 = vmatpush.bf16.msra.mxu1 %v774_v25 }
  0x29   : > { %513 = vmatpush.bf16.msra.mxu2 %v790_v26 }
  0x2b   : > { %372 = vmatpush.bf16.msra.mxu0 %v781_v29 }
  0x2c   : > { %433 = vmatpush.bf16.msra.mxu1 %v773_v30 }
  0x2d   : > { %514 = vmatpush.bf16.msra.mxu2 %v789_v31 }
  0x2e   : > { %373 = vmatmul.bf16.vlgmr.msra.gmra.mxu0 %v315_v32 }
  0x2f   : > { %434 = vmatmul.bf16.vlgmr.msra.gmra.mxu1 %v275_v22 }
  0x30   : > { %515 = vmatmul.bf16.vlgmr.msra.gmra.mxu2 %v457_v33 }
  0xab   : > { %v374_v34 = vpop.f32.mrf.mxu0 }
  0xac   : > { %v435_v35 = vpop.f32.mrf.mxu1 }
  0xad   : > { %v436_v36 = vadd.f32 %v435_v35, %v374_v34 }
  0xb3   : > { %v516_v38 = vpop.f32.mrf.mxu2  ;;  %v376_v41 = vpop.f32.mrf.mxu0 }
  0xb4   : > { %v520_v39 = vadd.f32 %v516_v38, %v436_v36  ;;  %v437_v42 = vpop.f32.mrf.mxu1 }
  0xb6   : > { %v523_v43 = vmul.f32 %v838_v37, %v520_v39 }
  0xb8   : > { %v526_v44 = vadd.f32 %v839_v40, %v523_v43 }
  0xba   : > { %v527_v45 = vmax.f32 %v526_v44, 0.0 }
  0xbb   : > { %v518_v46 = vpop.f32.mrf.mxu2 }
  0xbc   : > { %v528_v47 = vpack.c.bf16 %v527_v45, %v527_v45 }
  0xbe   : > { %529 = vst [vmem:[%s266_s16] sm:$0xf] %v528_v47 }
  0xbf PF: > { %s14_s19 = sadd.s32 1, %s878_s19   ;;  %s1053_s15 = smov %s870_s17 }
  0xc0   : > { %p11_p9 = scmp.ge.s32.totalorder %s14_s19, 6   ;;  %s1054_s16 = smov %s874_s18 }
  0xc1   : > { %s1055_s17 = smov %s1058_s20  ;;  %s1056_s18 = smov %s1062_s21 }
  0xc2   :  { %13 = sbr.rel (!%p11_p9) target bundleno = 3 (0x3), region = 71 }

</bundles_post_ra>
